<compile_context>
chip_gen: v5e
topology: v5e:2x2
jax: 0.10.0
libtpu: 0.0.40
codegen_flags: <defaults>
</compile_context>

<pallas_src>
import functools

import jax
import jax.numpy as jnp
from jax.experimental import pallas as pl
from jax.experimental.pallas import tpu as pltpu

_LANE = 128
_SUBLANE = 8


def _cdiv(a, b):
    return -(-a // b)


def _round_up(x, m):
    return _cdiv(x, m) * m


def _pad2(a, rows, cols):
    return jnp.pad(a, ((0, rows - a.shape[0]), (0, cols - a.shape[1])))


# --------------------------------------------------------------------------
# Kernel
# --------------------------------------------------------------------------
def _actor_kernel(obs_ref, w1_ref, b1_ref, w2_ref, b2_ref, wh_ref, bh_ref,
                  out_ref, *, log_std_min, log_std_max, n_actions):
    cd = w1_ref.dtype                       # MXU compute dtype (bf16 or f32)
    x = obs_ref[...].astype(cd)             # obs arrives unpadded f32; cast in-kernel

    # fc1 + relu (f32 accumulate, f32 bias/relu, cast back for the MXU)
    h1 = jnp.dot(x, w1_ref[...], preferred_element_type=jnp.float32) + b1_ref[...]
    h1 = jnp.maximum(h1, 0.0).astype(cd)

    # fc2 + relu
    h2 = jnp.dot(h1, w2_ref[...], preferred_element_type=jnp.float32) + b2_ref[...]
    h2 = jnp.maximum(h2, 0.0).astype(cd)

    # fused heads: ONE matmul producing [TB, HEAD_pad]
    #   lanes [0, A)   : mean
    #   lanes [A, 2A)  : log_std  -> clip + exp applied only here
    heads = jnp.dot(h2, wh_ref[...], preferred_element_type=jnp.float32) + bh_ref[...]

    lane = jax.lax.broadcasted_iota(jnp.int32, heads.shape, 1)
    is_log_std = jnp.logical_and(lane >= n_actions, lane < 2 * n_actions)
    fused = jnp.where(is_log_std,
                      jnp.exp(jnp.clip(heads, log_std_min, log_std_max)),
                      heads)
    out_ref[...] = fused.astype(out_ref.dtype)   # single lane-dense store


# --------------------------------------------------------------------------
# Parameter preparation (do once, reuse across calls)
# --------------------------------------------------------------------------
def prepare_actor_params(params, *, compute_dtype=jnp.bfloat16):
    """Pad / fuse / cast the Actor weights once.  Returns a dict of device arrays."""
    w1, b1, w2, b2, wm, bm, ws, bs = params
    F, H = w1.shape
    A = wm.shape[1]
    H_pad = _round_up(H, _LANE)
    HEAD_pad = _round_up(2 * A, _LANE)      # one 128-lane block when 2*A <= 128

    # Fused head weights/bias: mean columns [0, A), log_std columns [A, 2A).
    wh = jnp.concatenate([wm, ws], axis=1)          # [H, 2A]
    bh = jnp.concatenate([bm, bs], axis=1)          # [1, 2A]

    return dict(
        w1=_pad2(w1, F, H_pad).astype(compute_dtype),        # [F, H_pad] (F unpadded)
        b1=_pad2(b1, 1, H_pad).astype(jnp.float32),
        w2=_pad2(w2, H_pad, H_pad).astype(compute_dtype),
        b2=_pad2(b2, 1, H_pad).astype(jnp.float32),
        wh=_pad2(wh, H_pad, HEAD_pad).astype(compute_dtype),
        bh=_pad2(bh, 1, HEAD_pad).astype(jnp.float32),
        n_features=F, n_actions=A,
    )


def _choose_batch_tiling(B, block_b, min_grid_steps):
    # >= min_grid_steps grid steps when B allows it (feeds both v7x TCs),
    # <= block_b rows per step, >= 8 rows per step, waste < TB.
    n_steps = max(_cdiv(B, block_b), min_grid_steps)
    n_steps = min(n_steps, max(1, B // _SUBLANE))
    tb = _round_up(_cdiv(B, n_steps), _SUBLANE)
    n_steps = _cdiv(B, tb)
    return tb, n_steps, tb * n_steps


# --------------------------------------------------------------------------
# Forward wrapper
# --------------------------------------------------------------------------
def actor_forward(obs, prepared, *, log_std_min=-20.0, log_std_max=2.0,
                  out_dtype=jnp.float32, block_b=1024, min_grid_steps=2):
    """obs: [B, n_features] float32 -> (mean [B, A], std [B, A]) in out_dtype."""
    w1p, b1p, w2p, b2p, whp, bhp = (prepared[k] for k in
                                    ("w1", "b1", "w2", "b2", "wh", "bh"))
    A = prepared["n_actions"]
    F = prepared["n_features"]
    B, F_in = obs.shape
    assert F_in == F, "obs feature dim does not match prepared params"
    H_pad = w1p.shape[1]
    HEAD_pad = whp.shape[1]

    TB, n_steps, B_pad = _choose_batch_tiling(B, block_b, min_grid_steps)
    obs_p = obs if B_pad == B else jnp.pad(obs, ((0, B_pad - B), (0, 0)))

    kernel = functools.partial(_actor_kernel,
                               log_std_min=float(log_std_min),
                               log_std_max=float(log_std_max),
                               n_actions=A)

    def _call(single_buffer_weights):
        # Constant-index_map blocks never change across the grid; single-buffer
        # them to halve resident-weight VMEM (matters for large hidden sizes).
        res_kw = dict(pipeline_mode=pl.Buffered(1)) if single_buffer_weights else {}
        in_specs = [
            pl.BlockSpec((TB, F), lambda i: (i, 0)),                          # obs (f32, batch-tiled)
            pl.BlockSpec((F, H_pad), lambda i: (0, 0), **res_kw),             # W1 (resident)
            pl.BlockSpec((1, H_pad), lambda i: (0, 0), **res_kw),             # b1
            pl.BlockSpec((H_pad, H_pad), lambda i: (0, 0), **res_kw),         # W2
            pl.BlockSpec((1, H_pad), lambda i: (0, 0), **res_kw),             # b2
            pl.BlockSpec((H_pad, HEAD_pad), lambda i: (0, 0), **res_kw),      # fused heads W
            pl.BlockSpec((1, HEAD_pad), lambda i: (0, 0), **res_kw),          # fused heads b
        ]
        return pl.pallas_call(
            kernel,
            grid=(n_steps,),
            in_specs=in_specs,
            out_specs=pl.BlockSpec((TB, HEAD_pad), lambda i: (i, 0)),
            out_shape=jax.ShapeDtypeStruct((B_pad, HEAD_pad), out_dtype),
            compiler_params=pltpu.CompilerParams(
                dimension_semantics=("parallel",),        # megacore split on v7x
                vmem_limit_bytes=32 * 1024 * 1024),       # safe on v5e/v6e/v7x
        )(obs_p, w1p, b1p, w2p, b2p, whp, bhp)

    try:
        fused = _call(single_buffer_weights=True)
    except Exception:
        # pl.Buffered(1) unsupported on this jax build -> default double buffering.
        fused = _call(single_buffer_weights=False)

    mean = fused[:B, :A]
    std = fused[:B, A:2 * A]
    return mean, std


# --------------------------------------------------------------------------
# Init + pure-JAX reference
# --------------------------------------------------------------------------
def _orthogonal(key, out_dim, in_dim, gain=1.0):
    """Deterministic orthogonal init for a PyTorch-style (out, in) weight."""
    n = max(out_dim, in_dim)
    a = jax.random.normal(key, (n, n), dtype=jnp.float32)
    q, r = jnp.linalg.qr(a)
    d = jnp.diag(r)
    q = q * jnp.where(d >= 0, 1.0, -1.0)[None, :]
    return gain * q[:out_dim, :in_dim]


def init_actor_params(key, n_features, n_actions, hidden_size, bias_const=1e-6):
    k1, k2, k3, k4 = jax.random.split(key, 4)
    # PyTorch Linear weight is (out, in); store transposed (in, out) so the
    # kernel computes x @ W directly.
    w1 = _orthogonal(k1, hidden_size, n_features).T
    w2 = _orthogonal(k2, hidden_size, hidden_size).T
    wm = _orthogonal(k3, n_actions, hidden_size).T
    ws = _orthogonal(k4, n_actions, hidden_size).T
    b1 = jnp.full((1, hidden_size), bias_const, dtype=jnp.float32)
    b2 = jnp.full((1, hidden_size), bias_const, dtype=jnp.float32)
    bm = jnp.full((1, n_actions), bias_const, dtype=jnp.float32)
    bs = jnp.full((1, n_actions), bias_const, dtype=jnp.float32)
    return (w1, b1, w2, b2, wm, bm, ws, bs)


def actor_forward_ref(obs, params, *, log_std_min=-20.0, log_std_max=2.0,
                      compute_dtype=jnp.float32):
    """Pure-JAX reference of Actor.forward matching the kernel's cast points."""
    w1, b1, w2, b2, wm, bm, ws, bs = params
    cd = compute_dtype
    x = obs.astype(cd)
    h1 = jnp.dot(x, w1.astype(cd), preferred_element_type=jnp.float32) + b1
    h1 = jax.nn.relu(h1).astype(cd)
    h2 = jnp.dot(h1, w2.astype(cd), preferred_element_type=jnp.float32) + b2
    h2 = jax.nn.relu(h2).astype(cd)
    mean = jnp.dot(h2, wm.astype(cd), preferred_element_type=jnp.float32) + bm
    log_std = jnp.dot(h2, ws.astype(cd), preferred_element_type=jnp.float32) + bs
    log_std = jnp.clip(log_std, log_std_min, log_std_max)
    return mean, jnp.exp(log_std)


if __name__ == "__main__":
    key = jax.random.PRNGKey(0)
    k_obs, k_params = jax.random.split(key)

    batch = 8
    n_features = 16
    n_actions = 4
    hidden_size = 32
    log_std_min, log_std_max = -20.0, 2.0

    obs = jax.random.normal(k_obs, (batch, n_features), dtype=jnp.float32)
    params = init_actor_params(k_params, n_features, n_actions, hidden_size)

    # --- exact f32 path (semantics match the PyTorch module) ---
    prep_f32 = prepare_actor_params(params, compute_dtype=jnp.float32)
    mean32, std32 = actor_forward(obs, prep_f32,
                                  log_std_min=log_std_min, log_std_max=log_std_max)
    jax.block_until_ready((mean32, std32))
    assert mean32.shape == (batch, n_actions) and std32.shape == (batch, n_actions)
    mean_ref, std_ref = actor_forward_ref(obs, params,
                                          log_std_min=log_std_min,
                                          log_std_max=log_std_max,
                                          compute_dtype=jnp.float32)
    assert jnp.allclose(mean32, mean_ref, atol=1e-4, rtol=1e-4)
    assert jnp.allclose(std32, std_ref, atol=1e-4, rtol=1e-4)

    # --- bf16-MXU-operand fast path (f32 accumulation, f32 outputs) ---
    prep_bf16 = prepare_actor_params(params, compute_dtype=jnp.bfloat16)
    mean_bf, std_bf = actor_forward(obs, prep_bf16,
                                    log_std_min=log_std_min, log_std_max=log_std_max)
    jax.block_until_ready((mean_bf, std_bf))
    mean_ref_bf, std_ref_bf = actor_forward_ref(obs, params,
                                                log_std_min=log_std_min,
                                                log_std_max=log_std_max,
                                                compute_dtype=jnp.bfloat16)
    assert jnp.allclose(mean_bf, mean_ref_bf, atol=3e-3, rtol=3e-3)
    assert jnp.allclose(std_bf, std_ref_bf, atol=3e-3, rtol=3e-3)

    # TODO(synk): sample_normal / choose_action (Normal rsample + tanh log-prob
    # correction) are stochastic policy sampling; they could be fused in-kernel
    # via pltpu.prng_seed/prng_random_bits, but are left to host-side jax.random.

    print("KERNEL_OK")
</pallas_src>

<mosaic_0001>
module attributes {stable_mosaic.version = 11 : i64} {
  func.func @_actor_kernel(%arg0: i32, %arg1: memref<8x16xf32, #tpu.memory_space<vmem>>, %arg2: memref<16x128xf32, #tpu.memory_space<vmem>>, %arg3: memref<1x128xf32, #tpu.memory_space<vmem>>, %arg4: memref<128x128xf32, #tpu.memory_space<vmem>>, %arg5: memref<1x128xf32, #tpu.memory_space<vmem>>, %arg6: memref<128x128xf32, #tpu.memory_space<vmem>>, %arg7: memref<1x128xf32, #tpu.memory_space<vmem>>, %arg8: memref<8x128xf32, #tpu.memory_space<vmem>>) attributes {dimension_semantics = [#tpu.dimension_semantics<parallel>], iteration_bounds = array<i64: 1>, scalar_prefetch = 0 : i64, scratch_operands = 0 : i64, tpu.core_type = #tpu.core_type<tc>, window_params = [{transform_indices = @transform_0, window_bounds = array<i64: 8, 16>}, {pipeline_mode = #tpu.pipeline_mode<synchronous>, transform_indices = @transform_1, window_bounds = array<i64: 16, 128>}, {pipeline_mode = #tpu.pipeline_mode<synchronous>, transform_indices = @transform_2, window_bounds = array<i64: 1, 128>}, {pipeline_mode = #tpu.pipeline_mode<synchronous>, transform_indices = @transform_3, window_bounds = array<i64: 128, 128>}, {pipeline_mode = #tpu.pipeline_mode<synchronous>, transform_indices = @transform_4, window_bounds = array<i64: 1, 128>}, {pipeline_mode = #tpu.pipeline_mode<synchronous>, transform_indices = @transform_5, window_bounds = array<i64: 128, 128>}, {pipeline_mode = #tpu.pipeline_mode<synchronous>, transform_indices = @transform_6, window_bounds = array<i64: 1, 128>}, {transform_indices = @transform_7, window_bounds = array<i64: 8, 128>}]} {
    %c0 = arith.constant 0 : index
    %c0_0 = arith.constant 0 : index
    %0 = vector.load %arg1[%c0, %c0_0] : memref<8x16xf32, #tpu.memory_space<vmem>>, vector<8x16xf32>
    %c0_1 = arith.constant 0 : index
    %c0_2 = arith.constant 0 : index
    %1 = vector.load %arg2[%c0_1, %c0_2] : memref<16x128xf32, #tpu.memory_space<vmem>>, vector<16x128xf32>
    %cst = arith.constant dense<0.000000e+00> : vector<8x128xf32>
    %2 = tpu.matmul %0, %1, %cst {dimension_numbers = #tpu.dot_dimension_numbers<[1], [0], [0], [1], [0, 0, 1, 1], [], []>} : vector<8x16xf32>, vector<16x128xf32>, vector<8x128xf32> -> vector<8x128xf32>
    %c0_3 = arith.constant 0 : index
    %c0_4 = arith.constant 0 : index
    %3 = vector.load %arg3[%c0_3, %c0_4] : memref<1x128xf32, #tpu.memory_space<vmem>>, vector<1x128xf32>
    %4 = vector.broadcast %3 : vector<1x128xf32> to vector<8x128xf32>
    %5 = arith.addf %2, %4 : vector<8x128xf32>
    %cst_5 = arith.constant 0.000000e+00 : f32
    %6 = vector.broadcast %cst_5 : f32 to vector<8x128xf32>
    %7 = arith.maximumf %5, %6 : vector<8x128xf32>
    %c0_6 = arith.constant 0 : index
    %c0_7 = arith.constant 0 : index
    %8 = vector.load %arg4[%c0_6, %c0_7] : memref<128x128xf32, #tpu.memory_space<vmem>>, vector<128x128xf32>
    %cst_8 = arith.constant dense<0.000000e+00> : vector<8x128xf32>
    %9 = tpu.matmul %7, %8, %cst_8 {dimension_numbers = #tpu.dot_dimension_numbers<[1], [0], [0], [1], [0, 0, 1, 1], [], []>} : vector<8x128xf32>, vector<128x128xf32>, vector<8x128xf32> -> vector<8x128xf32>
    %c0_9 = arith.constant 0 : index
    %c0_10 = arith.constant 0 : index
    %10 = vector.load %arg5[%c0_9, %c0_10] : memref<1x128xf32, #tpu.memory_space<vmem>>, vector<1x128xf32>
    %11 = vector.broadcast %10 : vector<1x128xf32> to vector<8x128xf32>
    %12 = arith.addf %9, %11 : vector<8x128xf32>
    %cst_11 = arith.constant 0.000000e+00 : f32
    %13 = vector.broadcast %cst_11 : f32 to vector<8x128xf32>
    %14 = arith.maximumf %12, %13 : vector<8x128xf32>
    %c0_12 = arith.constant 0 : index
    %c0_13 = arith.constant 0 : index
    %15 = vector.load %arg6[%c0_12, %c0_13] : memref<128x128xf32, #tpu.memory_space<vmem>>, vector<128x128xf32>
    %cst_14 = arith.constant dense<0.000000e+00> : vector<8x128xf32>
    %16 = tpu.matmul %14, %15, %cst_14 {dimension_numbers = #tpu.dot_dimension_numbers<[1], [0], [0], [1], [0, 0, 1, 1], [], []>} : vector<8x128xf32>, vector<128x128xf32>, vector<8x128xf32> -> vector<8x128xf32>
    %c0_15 = arith.constant 0 : index
    %c0_16 = arith.constant 0 : index
    %17 = vector.load %arg7[%c0_15, %c0_16] : memref<1x128xf32, #tpu.memory_space<vmem>>, vector<1x128xf32>
    %18 = vector.broadcast %17 : vector<1x128xf32> to vector<8x128xf32>
    %19 = arith.addf %16, %18 : vector<8x128xf32>
    %20 = tpu.iota {dimensions = array<i32: 1>} : vector<8x128xi32>
    %c4_i32 = arith.constant 4 : i32
    %21 = vector.broadcast %c4_i32 : i32 to vector<8x128xi32>
    %22 = arith.cmpi sge, %20, %21 : vector<8x128xi32>
    %c8_i32 = arith.constant 8 : i32
    %23 = vector.broadcast %c8_i32 : i32 to vector<8x128xi32>
    %24 = arith.cmpi slt, %20, %23 : vector<8x128xi32>
    %25 = arith.andi %22, %24 : vector<8x128xi1>
    %cst_17 = arith.constant -2.000000e+01 : f32
    %cst_18 = arith.constant 2.000000e+00 : f32
    %26 = vector.broadcast %cst_17 : f32 to vector<8x128xf32>
    %27 = arith.maximumf %26, %19 : vector<8x128xf32>
    %28 = vector.broadcast %cst_18 : f32 to vector<8x128xf32>
    %29 = arith.minimumf %28, %27 : vector<8x128xf32>
    %30 = math.exp %29 : vector<8x128xf32>
    %31 = arith.select %25, %30, %19 : vector<8x128xi1>, vector<8x128xf32>
    %c0_19 = arith.constant 0 : index
    %c0_20 = arith.constant 0 : index
    %32 = vector.load %arg8[%c0_19, %c0_20] : memref<8x128xf32, #tpu.memory_space<vmem>>, vector<8x128xf32>
    tpu.vector_store %arg8[%c0_19, %c0_20], %31 {strides = array<i32>} : memref<8x128xf32, #tpu.memory_space<vmem>>, vector<8x128xf32>,
    return
  }
  func.func @transform_0(%arg0: i32) -> (i32, i32) {
    %c0_i32 = arith.constant 0 : i32
    %c0_i32_0 = arith.constant 0 : i32
    return %arg0, %c0_i32 : i32, i32
  }
  func.func @transform_1(%arg0: i32) -> (i32, i32) {
    %c0_i32 = arith.constant 0 : i32
    %c0_i32_0 = arith.constant 0 : i32
    %c0_i32_1 = arith.constant 0 : i32
    return %c0_i32, %c0_i32_0 : i32, i32
  }
  func.func @transform_2(%arg0: i32) -> (i32, i32) {
    %c0_i32 = arith.constant 0 : i32
    %c0_i32_0 = arith.constant 0 : i32
    %c0_i32_1 = arith.constant 0 : i32
    return %c0_i32, %c0_i32_0 : i32, i32
  }
  func.func @transform_3(%arg0: i32) -> (i32, i32) {
    %c0_i32 = arith.constant 0 : i32
    %c0_i32_0 = arith.constant 0 : i32
    %c0_i32_1 = arith.constant 0 : i32
    return %c0_i32, %c0_i32_0 : i32, i32
  }
  func.func @transform_4(%arg0: i32) -> (i32, i32) {
    %c0_i32 = arith.constant 0 : i32
    %c0_i32_0 = arith.constant 0 : i32
    %c0_i32_1 = arith.constant 0 : i32
    return %c0_i32, %c0_i32_0 : i32, i32
  }
  func.func @transform_5(%arg0: i32) -> (i32, i32) {
    %c0_i32 = arith.constant 0 : i32
    %c0_i32_0 = arith.constant 0 : i32
    %c0_i32_1 = arith.constant 0 : i32
    return %c0_i32, %c0_i32_0 : i32, i32
  }
  func.func @transform_6(%arg0: i32) -> (i32, i32) {
    %c0_i32 = arith.constant 0 : i32
    %c0_i32_0 = arith.constant 0 : i32
    %c0_i32_1 = arith.constant 0 : i32
    return %c0_i32, %c0_i32_0 : i32, i32
  }
  func.func @transform_7(%arg0: i32) -> (i32, i32) {
    %c0_i32 = arith.constant 0 : i32
    %c0_i32_0 = arith.constant 0 : i32
    return %arg0, %c0_i32 : i32, i32
  }
}

module attributes {stable_mosaic.version = 11 : i64} {
  func.func @_actor_kernel(%arg0: i32, %arg1: memref<8x16xf32, #tpu.memory_space<vmem>>, %arg2: memref<16x128xf32, #tpu.memory_space<vmem>>, %arg3: memref<1x128xf32, #tpu.memory_space<vmem>>, %arg4: memref<128x128xf32, #tpu.memory_space<vmem>>, %arg5: memref<1x128xf32, #tpu.memory_space<vmem>>, %arg6: memref<128x128xf32, #tpu.memory_space<vmem>>, %arg7: memref<1x128xf32, #tpu.memory_space<vmem>>, %arg8: memref<8x128xf32, #tpu.memory_space<vmem>>) attributes {dimension_semantics = [#tpu.dimension_semantics<parallel>], iteration_bounds = array<i64: 1>, scalar_prefetch = 0 : i64, scratch_operands = 0 : i64, tpu.core_type = #tpu.core_type<tc>, window_params = [{transform_indices = @transform_0, window_bounds = array<i64: 8, 16>}, {pipeline_mode = #tpu.pipeline_mode<synchronous>, transform_indices = @transform_1, window_bounds = array<i64: 16, 128>}, {pipeline_mode = #tpu.pipeline_mode<synchronous>, transform_indices = @transform_2, window_bounds = array<i64: 1, 128>}, {pipeline_mode = #tpu.pipeline_mode<synchronous>, transform_indices = @transform_3, window_bounds = array<i64: 128, 128>}, {pipeline_mode = #tpu.pipeline_mode<synchronous>, transform_indices = @transform_4, window_bounds = array<i64: 1, 128>}, {pipeline_mode = #tpu.pipeline_mode<synchronous>, transform_indices = @transform_5, window_bounds = array<i64: 128, 128>}, {pipeline_mode = #tpu.pipeline_mode<synchronous>, transform_indices = @transform_6, window_bounds = array<i64: 1, 128>}, {transform_indices = @transform_7, window_bounds = array<i64: 8, 128>}]} {
    %c0 = arith.constant 0 : index
    %c0_0 = arith.constant 0 : index
    %0 = vector.load %arg1[%c0, %c0_0] : memref<8x16xf32, #tpu.memory_space<vmem>>, vector<8x16xf32>
    %c0_1 = arith.constant 0 : index
    %c0_2 = arith.constant 0 : index
    %1 = vector.load %arg2[%c0_1, %c0_2] : memref<16x128xf32, #tpu.memory_space<vmem>>, vector<16x128xf32>
    %cst = arith.constant dense<0.000000e+00> : vector<8x128xf32>
    %2 = tpu.matmul %0, %1, %cst {dimension_numbers = #tpu.dot_dimension_numbers<[1], [0], [0], [1], [0, 0, 1, 1], [], []>} : vector<8x16xf32>, vector<16x128xf32>, vector<8x128xf32> -> vector<8x128xf32>
    %c0_3 = arith.constant 0 : index
    %c0_4 = arith.constant 0 : index
    %3 = vector.load %arg3[%c0_3, %c0_4] : memref<1x128xf32, #tpu.memory_space<vmem>>, vector<1x128xf32>
    %4 = vector.broadcast %3 : vector<1x128xf32> to vector<8x128xf32>
    %5 = arith.addf %2, %4 : vector<8x128xf32>
    %cst_5 = arith.constant 0.000000e+00 : f32
    %6 = vector.broadcast %cst_5 : f32 to vector<8x128xf32>
    %7 = arith.maximumf %5, %6 : vector<8x128xf32>
    %c0_6 = arith.constant 0 : index
    %c0_7 = arith.constant 0 : index
    %8 = vector.load %arg4[%c0_6, %c0_7] : memref<128x128xf32, #tpu.memory_space<vmem>>, vector<128x128xf32>
    %cst_8 = arith.constant dense<0.000000e+00> : vector<8x128xf32>
    %9 = tpu.matmul %7, %8, %cst_8 {dimension_numbers = #tpu.dot_dimension_numbers<[1], [0], [0], [1], [0, 0, 1, 1], [], []>} : vector<8x128xf32>, vector<128x128xf32>, vector<8x128xf32> -> vector<8x128xf32>
    %c0_9 = arith.constant 0 : index
    %c0_10 = arith.constant 0 : index
    %10 = vector.load %arg5[%c0_9, %c0_10] : memref<1x128xf32, #tpu.memory_space<vmem>>, vector<1x128xf32>
    %11 = vector.broadcast %10 : vector<1x128xf32> to vector<8x128xf32>
    %12 = arith.addf %9, %11 : vector<8x128xf32>
    %cst_11 = arith.constant 0.000000e+00 : f32
    %13 = vector.broadcast %cst_11 : f32 to vector<8x128xf32>
    %14 = arith.maximumf %12, %13 : vector<8x128xf32>
    %c0_12 = arith.constant 0 : index
    %c0_13 = arith.constant 0 : index
    %15 = vector.load %arg6[%c0_12, %c0_13] : memref<128x128xf32, #tpu.memory_space<vmem>>, vector<128x128xf32>
    %cst_14 = arith.constant dense<0.000000e+00> : vector<8x128xf32>
    %16 = tpu.matmul %14, %15, %cst_14 {dimension_numbers = #tpu.dot_dimension_numbers<[1], [0], [0], [1], [0, 0, 1, 1], [], []>} : vector<8x128xf32>, vector<128x128xf32>, vector<8x128xf32> -> vector<8x128xf32>
    %c0_15 = arith.constant 0 : index
    %c0_16 = arith.constant 0 : index
    %17 = vector.load %arg7[%c0_15, %c0_16] : memref<1x128xf32, #tpu.memory_space<vmem>>, vector<1x128xf32>
    %18 = vector.broadcast %17 : vector<1x128xf32> to vector<8x128xf32>
    %19 = arith.addf %16, %18 : vector<8x128xf32>
    %20 = tpu.iota {dimensions = array<i32: 1>} : vector<8x128xi32>
    %c4_i32 = arith.constant 4 : i32
    %21 = vector.broadcast %c4_i32 : i32 to vector<8x128xi32>
    %22 = arith.cmpi sge, %20, %21 : vector<8x128xi32>
    %c8_i32 = arith.constant 8 : i32
    %23 = vector.broadcast %c8_i32 : i32 to vector<8x128xi32>
    %24 = arith.cmpi slt, %20, %23 : vector<8x128xi32>
    %25 = arith.andi %22, %24 : vector<8x128xi1>
    %cst_17 = arith.constant -2.000000e+01 : f32
    %cst_18 = arith.constant 2.000000e+00 : f32
    %26 = vector.broadcast %cst_17 : f32 to vector<8x128xf32>
    %27 = arith.maximumf %26, %19 : vector<8x128xf32>
    %28 = vector.broadcast %cst_18 : f32 to vector<8x128xf32>
    %29 = arith.minimumf %28, %27 : vector<8x128xf32>
    %30 = math.exp %29 : vector<8x128xf32>
    %31 = arith.select %25, %30, %19 : vector<8x128xi1>, vector<8x128xf32>
    %c0_19 = arith.constant 0 : index
    %c0_20 = arith.constant 0 : index
    %32 = vector.load %arg8[%c0_19, %c0_20] : memref<8x128xf32, #tpu.memory_space<vmem>>, vector<8x128xf32>
    tpu.vector_store %arg8[%c0_19, %c0_20], %31 {strides = array<i32>} : memref<8x128xf32, #tpu.memory_space<vmem>>, vector<8x128xf32>,
    return
  }
  func.func @transform_0(%arg0: i32) -> (i32, i32) {
    %c0_i32 = arith.constant 0 : i32
    %c0_i32_0 = arith.constant 0 : i32
    return %arg0, %c0_i32 : i32, i32
  }
  func.func @transform_1(%arg0: i32) -> (i32, i32) {
    %c0_i32 = arith.constant 0 : i32
    %c0_i32_0 = arith.constant 0 : i32
    %c0_i32_1 = arith.constant 0 : i32
    return %c0_i32, %c0_i32_0 : i32, i32
  }
  func.func @transform_2(%arg0: i32) -> (i32, i32) {
    %c0_i32 = arith.constant 0 : i32
    %c0_i32_0 = arith.constant 0 : i32
    %c0_i32_1 = arith.constant 0 : i32
    return %c0_i32, %c0_i32_0 : i32, i32
  }
  func.func @transform_3(%arg0: i32) -> (i32, i32) {
    %c0_i32 = arith.constant 0 : i32
    %c0_i32_0 = arith.constant 0 : i32
    %c0_i32_1 = arith.constant 0 : i32
    return %c0_i32, %c0_i32_0 : i32, i32
  }
  func.func @transform_4(%arg0: i32) -> (i32, i32) {
    %c0_i32 = arith.constant 0 : i32
    %c0_i32_0 = arith.constant 0 : i32
    %c0_i32_1 = arith.constant 0 : i32
    return %c0_i32, %c0_i32_0 : i32, i32
  }
  func.func @transform_5(%arg0: i32) -> (i32, i32) {
    %c0_i32 = arith.constant 0 : i32
    %c0_i32_0 = arith.constant 0 : i32
    %c0_i32_1 = arith.constant 0 : i32
    return %c0_i32, %c0_i32_0 : i32, i32
  }
  func.func @transform_6(%arg0: i32) -> (i32, i32) {
    %c0_i32 = arith.constant 0 : i32
    %c0_i32_0 = arith.constant 0 : i32
    %c0_i32_1 = arith.constant 0 : i32
    return %c0_i32, %c0_i32_0 : i32, i32
  }
  func.func @transform_7(%arg0: i32) -> (i32, i32) {
    %c0_i32 = arith.constant 0 : i32
    %c0_i32_0 = arith.constant 0 : i32
    return %arg0, %c0_i32 : i32, i32
  }
}

</mosaic_0001>

<bundles_post_ra>
// kernel: tpu_custom_call.1
= control target key start
LH: loop header
LB: loop body
LE: loop exit
PB: predicated region body
PF: predicated region fallthrough
CT: control target
= control target key end

     0   :  { %12 = vsyncpa [#allocation3], 0  ;;  %s443_s0 = inlined_call_operand.hbm [shape: f32[8,16], index: 0, kind: input, shape index: {}]   ;;  %s444_s1 = inlined_call_operand.hbm [shape: f32[16,128], index: 1, kind: input, shape index: {}]   ;;  %s445_s2 = inlined_call_operand.vmem [shape: f32[1,128], index: 2, kind: input, shape index: {}]   ;;  %s446_s3 = inlined_call_operand.hbm [shape: f32[128,128], index: 3, kind: input, shape index: {}]   ;;  %s447_s4 = inlined_call_operand.vmem [shape: f32[1,128], index: 4, kind: input, shape index: {}]   ;;  %s448_s5 = inlined_call_operand.hbm [shape: f32[128,128], index: 5, kind: input, shape index: {}]   ;;  %s449_s6 = inlined_call_operand.vmem [shape: f32[1,128], index: 6, kind: input, shape index: {}]   ;;  %s450_s7 = inlined_call_operand.hbm [shape: f32[8,128], index: 7, kind: output, shape index: {}]  }
   0x1   :  { %13 = vsyncpa [#allocation6], 0 }
   0x2   :  { %14 = vsyncpa [#allocation9], 0  ;;  %s31_s26 = sshll.u32 %s444_s1, 4  ;;  %s32_s26 = int_to_ptr.hbm [resolvable:$true] %s31_s26 }
   0x3   :  { %15 = vsyncpa [#allocation4], 0  ;;  %s372_s27 = smov [#allocation5]   ;;  %s21_s8 = sshll.u32 %s443_s0, 4  ;;  %s22_s8 = int_to_ptr.hbm [resolvable:$true] %s21_s8 }
   0x4   :  { %s33_s28 = sshll.u32 %s372_s27, 4  ;;  %s373_s9 = smov 128   ;;  %s34_s28 = int_to_ptr.vmem [resolvable:$true] %s33_s28 }
   0x5   :  { %s374_s10 = smov 8   ;;  %s375_s11 = smov [#allocation2]  }
   0x6   :  { %39 = dma.hbm_to_vmem [thread:$0]  %s32_s26, 256, %s34_s28, [#allocation6], %s373_s9, %s373_s9, %s374_s10  }
   0x7   :  { %s23_s12 = sshll.u32 %s375_s11, 4  ;;  %s46_s15 = sshll.u32 %s446_s3, 4  ;;  %s24_s12 = int_to_ptr.vmem [resolvable:$true] %s23_s12  ;;  %s47_s15 = int_to_ptr.hbm [resolvable:$true] %s46_s15 }
   0x8   :  { %26 = dma.hbm_to_vmem [thread:$0]  %s22_s8, 128, %s24_s12, [#allocation3]  }
   0x9   :  { %s61_s17 = sshll.u32 %s448_s5, 4  ;;  %s376_s18 = smov [#allocation7]   ;;  %s62_s17 = int_to_ptr.hbm [resolvable:$true] %s61_s17 }
   0xa   :  { %s48_s19 = sshll.u32 %s376_s18, 4  ;;  %s377_s0 = smov [#allocation8]   ;;  %s49_s19 = int_to_ptr.vmem [resolvable:$true] %s48_s19 }
   0xb   :  { %54 = dma.hbm_to_vmem [thread:$0]  %s47_s15, 2048, %s49_s19, [#allocation6], %s373_s9, %s373_s9, %s374_s10  }
   0xc   :  { %s63_s20 = sshll.u32 %s377_s0, 4  ;;  %s64_s20 = int_to_ptr.vmem [resolvable:$true] %s63_s20 }
   0xd   :  { %69 = dma.hbm_to_vmem [thread:$0]  %s62_s17, 2048, %s64_s20, [#allocation9], %s373_s9, %s373_s9, %s374_s10  }
   0xe   :  { %364 = dma.done.wait [#allocation3], 128  }
   0xf   :  { %365 = vsyncadd [#allocation3], 4294967168 }
  0x10   :  { %366 = dma.done.wait [#allocation6], 2304  }
  0x11   :  { %367 = vsyncadd [#allocation6], 4294964992 }
  0x12   :  { %368 = dma.done.wait [#allocation9], 2048  }
  0x13   :  { %369 = vsyncadd [#allocation9], 4294965248  ;;  %v90_v0 = vld [vmem:[#allocation5 + $0x8] sm:$0xff]  ;;  %v89_v1 = vld [vmem:[#allocation5] sm:$0xff]  ;;  %vm95_vm0 = vcmask 130048   ;;  %v201_v46 = vlaneseq  ;;  %s378_s24 = smov [#allocation10]  }
  0x14   :  { %113 = vmatpush.msra.mxu0 %v90_v0  ;;  %v88_v2 = vld [vmem:[#allocation2] sm:$0xff]  ;;  %v135_v3 = vld [vmem:[#allocation7 + $0x78] sm:$0xff]  ;;  %v134_v4 = vld [vmem:[#allocation7 + $0x70] sm:$0xff]  ;;  %s219_s27 = sshll.u32 %s450_s7, 4  ;;  %s220_s27 = int_to_ptr.hbm [resolvable:$true] %s219_s27 }
  0x15   :  { %140 = vmatpush.msra.mxu1 %v135_v3  ;;  %v133_v5 = vld [vmem:[#allocation7 + $0x68] sm:$0xff]  ;;  %v132_v6 = vld [vmem:[#allocation7 + $0x60] sm:$0xff]  ;;  %v131_v7 = vld [vmem:[#allocation7 + $0x58] sm:$0xff]  ;;  %v202_v49 = vand.u32 127, %v201_v46 }
  0x16   :  { %114 = vmatpush.msra.mxu0 %v89_v1  ;;  %v130_v8 = vld [vmem:[#allocation7 + $0x50] sm:$0xff]  ;;  %v129_v9 = vld [vmem:[#allocation7 + $0x48] sm:$0xff]  ;;  %v128_v10 = vld [vmem:[#allocation7 + $0x40] sm:$0xff] }
  0x17   :  { %231 = vmatmul.msk.f32.vlgmr.msra.gmra.mxu0 %vm95_vm0, %v88_v2  ;;  %141 = vmatpush.msra.mxu1 %v134_v4  ;;  %v127_v11 = vld [vmem:[#allocation7 + $0x38] sm:$0xff]  ;;  %v126_v12 = vld [vmem:[#allocation7 + $0x30] sm:$0xff]  ;;  %v125_v13 = vld [vmem:[#allocation7 + $0x28] sm:$0xff]  ;;  %vm203_vm1 = vcmp.ge.s32.totalorder %v202_v49, 4  ;;  %vm204_vm2 = vcmp.lt.s32.totalorder %v202_v49, 8 }
  0x18   :  { %v124_v14 = vld [vmem:[#allocation7 + $0x20] sm:$0xff]  ;;  %v123_v15 = vld [vmem:[#allocation7 + $0x18] sm:$0xff]  ;;  %v122_v16 = vld [vmem:[#allocation7 + $0x10] sm:$0xff] }
  0x19   :  { %142 = vmatpush.msra.mxu1 %v133_v5  ;;  %v121_v17 = vld [vmem:[#allocation7 + $0x8] sm:$0xff]  ;;  %v120_v18 = vld [vmem:[#allocation7] sm:$0xff]  ;;  %v176_v19 = vld [vmem:[#allocation8 + $0x78] sm:$0xff] }
  0x1a   :  { %v175_v20 = vld [vmem:[#allocation8 + $0x70] sm:$0xff]  ;;  %181 = vmatpush.msra.mxu2 %v176_v19  ;;  %v174_v21 = vld [vmem:[#allocation8 + $0x68] sm:$0xff]  ;;  %v173_v22 = vld [vmem:[#allocation8 + $0x60] sm:$0xff] }
  0x1b   :  { %143 = vmatpush.msra.mxu1 %v132_v6  ;;  %v172_v23 = vld [vmem:[#allocation8 + $0x58] sm:$0xff]  ;;  %v171_v24 = vld [vmem:[#allocation8 + $0x50] sm:$0xff]  ;;  %v170_v25 = vld [vmem:[#allocation8 + $0x48] sm:$0xff] }
  0x1c   :  { %182 = vmatpush.msra.mxu2 %v175_v20  ;;  %v169_v26 = vld [vmem:[#allocation8 + $0x40] sm:$0xff]  ;;  %v168_v27 = vld [vmem:[#allocation8 + $0x38] sm:$0xff]  ;;  %v167_v28 = vld [vmem:[#allocation8 + $0x30] sm:$0xff] }
  0x1d   :  { %144 = vmatpush.msra.mxu1 %v131_v7  ;;  %v166_v29 = vld [vmem:[#allocation8 + $0x28] sm:$0xff]  ;;  %v165_v30 = vld [vmem:[#allocation8 + $0x20] sm:$0xff]  ;;  %v164_v31 = vld [vmem:[#allocation8 + $0x18] sm:$0xff] }
  0x1e   :  { %183 = vmatpush.msra.mxu2 %v174_v21  ;;  %v239_v32 = vld [vmem:[%s445_s2] ss:$0 sm:$0xff]  ;;  %v163_v36 = vld [vmem:[#allocation8 + $0x10] sm:$0xff]  ;;  %v161_v38 = vld [vmem:[#allocation8] sm:$0xff] }
  0x1f   :  { %145 = vmatpush.msra.mxu1 %v130_v8  ;;  %v162_v37 = vld [vmem:[#allocation8 + $0x8] sm:$0xff]  ;;  %vm205_vm3 = vmand %vm203_vm1, %vm204_vm2 }
  0x20   :  { %184 = vmatpush.msra.mxu2 %v173_v22  ;;  %v240_v39 = vld [vmem:[%s447_s4] ss:$0 sm:$0xff]  ;;  %s217_s4 = sshll.u32 %s378_s24, 4  ;;  %s218_s4 = int_to_ptr.vmem [resolvable:$true] %s217_s4 }
  0x21   :  { %146 = vmatpush.msra.mxu1 %v129_v9  ;;  %v241_v43 = vld [vmem:[%s449_s6] ss:$0 sm:$0xff] }
  0x22   :  { %185 = vmatpush.msra.mxu2 %v172_v23 }
  0x23   :  { %147 = vmatpush.msra.mxu1 %v128_v10 }
  0x24   :  { %186 = vmatpush.msra.mxu2 %v171_v24 }
  0x25   :  { %148 = vmatpush.msra.mxu1 %v127_v11 }
  0x26   :  { %187 = vmatpush.msra.mxu2 %v170_v25 }
  0x27   :  { %149 = vmatpush.msra.mxu1 %v126_v12 }
  0x28   :  { %188 = vmatpush.msra.mxu2 %v169_v26 }
  0x29   :  { %150 = vmatpush.msra.mxu1 %v125_v13 }
  0x2a   :  { %189 = vmatpush.msra.mxu2 %v168_v27 }
  0x2b   :  { %151 = vmatpush.msra.mxu1 %v124_v14 }
  0x2c   :  { %190 = vmatpush.msra.mxu2 %v167_v28 }
  0x2d   :  { %152 = vmatpush.msra.mxu1 %v123_v15 }
  0x2e   :  { %191 = vmatpush.msra.mxu2 %v166_v29 }
  0x2f   :  { %153 = vmatpush.msra.mxu1 %v122_v16 }
  0x30   :  { %192 = vmatpush.msra.mxu2 %v165_v30 }
  0x31   :  { %154 = vmatpush.msra.mxu1 %v121_v17 }
  0x32   :  { %193 = vmatpush.msra.mxu2 %v164_v31 }
  0x33   :  { %155 = vmatpush.msra.mxu1 %v120_v18 }
  0x34   :  { %194 = vmatpush.msra.mxu2 %v163_v36 }
  0x36   :  { %195 = vmatpush.msra.mxu2 %v162_v37 }
  0x38   :  { %196 = vmatpush.msra.mxu2 %v161_v38 }
  0x94   :  { %v116_v33 = vpop.f32.mrf.mxu0 }
  0x95   :  { %v117_v34 = vadd.f32 %v239_v32, %v116_v33 }
  0x97   :  { %v119_v35 = vmax.f32 %v117_v34, 0.0 }
  0x99   :  { %156 = vmatmul.f32.vlgmr.msra.gmra.mxu1 %v119_v35 }
 0x116   :  { %v157_v40 = vpop.f32.mrf.mxu1 }
 0x117   :  { %v158_v41 = vadd.f32 %v240_v39, %v157_v40 }
 0x119   :  { %v160_v42 = vmax.f32 %v158_v41, 0.0 }
 0x11b   :  { %197 = vmatmul.f32.vlgmr.msra.gmra.mxu2 %v160_v42 }
 0x19e   :  { %v198_v44 = vpop.f32.mrf.mxu2 }
 0x19f   :  { %v199_v45 = vadd.f32 %v241_v43, %v198_v44 }
 0x1a1   :  { %v206_v47 = vmax.f32 %v199_v45, -20.0 }
 0x1a3   :  { %v207_v48 = vmin.f32 %v206_v47, 2.0 }
 0x1a5   :  { %v208_v50 = vmul.f32 1.442695, %v207_v48 }
 0x1a7   :  { %242 = vpow2.f32 %v208_v50 }
 0x1ad   :  { %v243_v51 = vpop.eup %242 }
 0x1ae   :  { %v210_v52 = vsel %vm205_vm3, %v243_v51, %v199_v45 }
 0x1af   :  { %211 = vst [vmem:[#allocation10] sm:$0xff] %v210_v52 }
 0x1b0   :  { %222 = dma.vmem_to_hbm [thread:$0]  %s218_s4, 128, %s220_s27, [#allocation4]  }
 0x1b1   :  { %370 = dma.done.wait [#allocation4], 128  }
 0x1b2   :  { %371 = vsyncadd [#allocation4], 4294967168 }
 0x1b3   :  { %227 = vsyncpa [#allocation3], 1 }
 0x1b4   :  { %228 = vsyncpa [#allocation6], 1 }
 0x1b5   :  { %229 = vsyncpa [#allocation9], 1 }
 0x1b6   :  { %230 = vsyncpa [#allocation4], 1 }

// kernel: tpu_custom_call.1
= control target key start
LH: loop header
LB: loop body
LE: loop exit
PB: predicated region body
PF: predicated region fallthrough
CT: control target
= control target key end

     0   :  { %12 = vsyncpa [#allocation3], 0  ;;  %s443_s0 = inlined_call_operand.hbm [shape: f32[8,16], index: 0, kind: input, shape index: {}]   ;;  %s444_s1 = inlined_call_operand.hbm [shape: f32[16,128], index: 1, kind: input, shape index: {}]   ;;  %s445_s2 = inlined_call_operand.vmem [shape: f32[1,128], index: 2, kind: input, shape index: {}]   ;;  %s446_s3 = inlined_call_operand.hbm [shape: f32[128,128], index: 3, kind: input, shape index: {}]   ;;  %s447_s4 = inlined_call_operand.vmem [shape: f32[1,128], index: 4, kind: input, shape index: {}]   ;;  %s448_s5 = inlined_call_operand.hbm [shape: f32[128,128], index: 5, kind: input, shape index: {}]   ;;  %s449_s6 = inlined_call_operand.vmem [shape: f32[1,128], index: 6, kind: input, shape index: {}]   ;;  %s450_s7 = inlined_call_operand.hbm [shape: f32[8,128], index: 7, kind: output, shape index: {}]  }
   0x1   :  { %13 = vsyncpa [#allocation6], 0 }
   0x2   :  { %14 = vsyncpa [#allocation9], 0  ;;  %s31_s26 = sshll.u32 %s444_s1, 4  ;;  %s32_s26 = int_to_ptr.hbm [resolvable:$true] %s31_s26 }
   0x3   :  { %15 = vsyncpa [#allocation4], 0  ;;  %s372_s27 = smov [#allocation5]   ;;  %s21_s8 = sshll.u32 %s443_s0, 4  ;;  %s22_s8 = int_to_ptr.hbm [resolvable:$true] %s21_s8 }
   0x4   :  { %s33_s28 = sshll.u32 %s372_s27, 4  ;;  %s373_s9 = smov 128   ;;  %s34_s28 = int_to_ptr.vmem [resolvable:$true] %s33_s28 }
   0x5   :  { %s374_s10 = smov 8   ;;  %s375_s11 = smov [#allocation2]  }
   0x6   :  { %39 = dma.hbm_to_vmem [thread:$0]  %s32_s26, 256, %s34_s28, [#allocation6], %s373_s9, %s373_s9, %s374_s10  }
   0x7   :  { %s23_s12 = sshll.u32 %s375_s11, 4  ;;  %s46_s15 = sshll.u32 %s446_s3, 4  ;;  %s24_s12 = int_to_ptr.vmem [resolvable:$true] %s23_s12  ;;  %s47_s15 = int_to_ptr.hbm [resolvable:$true] %s46_s15 }
   0x8   :  { %26 = dma.hbm_to_vmem [thread:$0]  %s22_s8, 128, %s24_s12, [#allocation3]  }
   0x9   :  { %s61_s17 = sshll.u32 %s448_s5, 4  ;;  %s376_s18 = smov [#allocation7]   ;;  %s62_s17 = int_to_ptr.hbm [resolvable:$true] %s61_s17 }
   0xa   :  { %s48_s19 = sshll.u32 %s376_s18, 4  ;;  %s377_s0 = smov [#allocation8]   ;;  %s49_s19 = int_to_ptr.vmem [resolvable:$true] %s48_s19 }
   0xb   :  { %54 = dma.hbm_to_vmem [thread:$0]  %s47_s15, 2048, %s49_s19, [#allocation6], %s373_s9, %s373_s9, %s374_s10  }
   0xc   :  { %s63_s20 = sshll.u32 %s377_s0, 4  ;;  %s64_s20 = int_to_ptr.vmem [resolvable:$true] %s63_s20 }
   0xd   :  { %69 = dma.hbm_to_vmem [thread:$0]  %s62_s17, 2048, %s64_s20, [#allocation9], %s373_s9, %s373_s9, %s374_s10  }
   0xe   :  { %364 = dma.done.wait [#allocation3], 128  }
   0xf   :  { %365 = vsyncadd [#allocation3], 4294967168 }
  0x10   :  { %366 = dma.done.wait [#allocation6], 2304  }
  0x11   :  { %367 = vsyncadd [#allocation6], 4294964992 }
  0x12   :  { %368 = dma.done.wait [#allocation9], 2048  }
  0x13   :  { %369 = vsyncadd [#allocation9], 4294965248  ;;  %v90_v0 = vld [vmem:[#allocation5 + $0x8] sm:$0xff]  ;;  %v89_v1 = vld [vmem:[#allocation5] sm:$0xff]  ;;  %vm95_vm0 = vcmask 130048   ;;  %v201_v46 = vlaneseq  ;;  %s378_s24 = smov [#allocation10]  }
  0x14   :  { %113 = vmatpush.msra.mxu0 %v90_v0  ;;  %v88_v2 = vld [vmem:[#allocation2] sm:$0xff]  ;;  %v135_v3 = vld [vmem:[#allocation7 + $0x78] sm:$0xff]  ;;  %v134_v4 = vld [vmem:[#allocation7 + $0x70] sm:$0xff]  ;;  %s219_s27 = sshll.u32 %s450_s7, 4  ;;  %s220_s27 = int_to_ptr.hbm [resolvable:$true] %s219_s27 }
  0x15   :  { %140 = vmatpush.msra.mxu1 %v135_v3  ;;  %v133_v5 = vld [vmem:[#allocation7 + $0x68] sm:$0xff]  ;;  %v132_v6 = vld [vmem:[#allocation7 + $0x60] sm:$0xff]  ;;  %v131_v7 = vld [vmem:[#allocation7 + $0x58] sm:$0xff]  ;;  %v202_v49 = vand.u32 127, %v201_v46 }
  0x16   :  { %114 = vmatpush.msra.mxu0 %v89_v1  ;;  %v130_v8 = vld [vmem:[#allocation7 + $0x50] sm:$0xff]  ;;  %v129_v9 = vld [vmem:[#allocation7 + $0x48] sm:$0xff]  ;;  %v128_v10 = vld [vmem:[#allocation7 + $0x40] sm:$0xff] }
  0x17   :  { %231 = vmatmul.msk.f32.vlgmr.msra.gmra.mxu0 %vm95_vm0, %v88_v2  ;;  %141 = vmatpush.msra.mxu1 %v134_v4  ;;  %v127_v11 = vld [vmem:[#allocation7 + $0x38] sm:$0xff]  ;;  %v126_v12 = vld [vmem:[#allocation7 + $0x30] sm:$0xff]  ;;  %v125_v13 = vld [vmem:[#allocation7 + $0x28] sm:$0xff]  ;;  %vm203_vm1 = vcmp.ge.s32.totalorder %v202_v49, 4  ;;  %vm204_vm2 = vcmp.lt.s32.totalorder %v202_v49, 8 }
  0x18   :  { %v124_v14 = vld [vmem:[#allocation7 + $0x20] sm:$0xff]  ;;  %v123_v15 = vld [vmem:[#allocation7 + $0x18] sm:$0xff]  ;;  %v122_v16 = vld [vmem:[#allocation7 + $0x10] sm:$0xff] }
  0x19   :  { %142 = vmatpush.msra.mxu1 %v133_v5  ;;  %v121_v17 = vld [vmem:[#allocation7 + $0x8] sm:$0xff]  ;;  %v120_v18 = vld [vmem:[#allocation7] sm:$0xff]  ;;  %v176_v19 = vld [vmem:[#allocation8 + $0x78] sm:$0xff] }
  0x1a   :  { %v175_v20 = vld [vmem:[#allocation8 + $0x70] sm:$0xff]  ;;  %181 = vmatpush.msra.mxu2 %v176_v19  ;;  %v174_v21 = vld [vmem:[#allocation8 + $0x68] sm:$0xff]  ;;  %v173_v22 = vld [vmem:[#allocation8 + $0x60] sm:$0xff] }
  0x1b   :  { %143 = vmatpush.msra.mxu1 %v132_v6  ;;  %v172_v23 = vld [vmem:[#allocation8 + $0x58] sm:$0xff]  ;;  %v171_v24 = vld [vmem:[#allocation8 + $0x50] sm:$0xff]  ;;  %v170_v25 = vld [vmem:[#allocation8 + $0x48] sm:$0xff] }
  0x1c   :  { %182 = vmatpush.msra.mxu2 %v175_v20  ;;  %v169_v26 = vld [vmem:[#allocation8 + $0x40] sm:$0xff]  ;;  %v168_v27 = vld [vmem:[#allocation8 + $0x38] sm:$0xff]  ;;  %v167_v28 = vld [vmem:[#allocation8 + $0x30] sm:$0xff] }
  0x1d   :  { %144 = vmatpush.msra.mxu1 %v131_v7  ;;  %v166_v29 = vld [vmem:[#allocation8 + $0x28] sm:$0xff]  ;;  %v165_v30 = vld [vmem:[#allocation8 + $0x20] sm:$0xff]  ;;  %v164_v31 = vld [vmem:[#allocation8 + $0x18] sm:$0xff] }
  0x1e   :  { %183 = vmatpush.msra.mxu2 %v174_v21  ;;  %v239_v32 = vld [vmem:[%s445_s2] ss:$0 sm:$0xff]  ;;  %v163_v36 = vld [vmem:[#allocation8 + $0x10] sm:$0xff]  ;;  %v161_v38 = vld [vmem:[#allocation8] sm:$0xff] }
  0x1f   :  { %145 = vmatpush.msra.mxu1 %v130_v8  ;;  %v162_v37 = vld [vmem:[#allocation8 + $0x8] sm:$0xff]  ;;  %vm205_vm3 = vmand %vm203_vm1, %vm204_vm2 }
  0x20   :  { %184 = vmatpush.msra.mxu2 %v173_v22  ;;  %v240_v39 = vld [vmem:[%s447_s4] ss:$0 sm:$0xff]  ;;  %s217_s4 = sshll.u32 %s378_s24, 4  ;;  %s218_s4 = int_to_ptr.vmem [resolvable:$true] %s217_s4 }
  0x21   :  { %146 = vmatpush.msra.mxu1 %v129_v9  ;;  %v241_v43 = vld [vmem:[%s449_s6] ss:$0 sm:$0xff] }
  0x22   :  { %185 = vmatpush.msra.mxu2 %v172_v23 }
  0x23   :  { %147 = vmatpush.msra.mxu1 %v128_v10 }
  0x24   :  { %186 = vmatpush.msra.mxu2 %v171_v24 }
  0x25   :  { %148 = vmatpush.msra.mxu1 %v127_v11 }
  0x26   :  { %187 = vmatpush.msra.mxu2 %v170_v25 }
  0x27   :  { %149 = vmatpush.msra.mxu1 %v126_v12 }
  0x28   :  { %188 = vmatpush.msra.mxu2 %v169_v26 }
  0x29   :  { %150 = vmatpush.msra.mxu1 %v125_v13 }
  0x2a   :  { %189 = vmatpush.msra.mxu2 %v168_v27 }
  0x2b   :  { %151 = vmatpush.msra.mxu1 %v124_v14 }
  0x2c   :  { %190 = vmatpush.msra.mxu2 %v167_v28 }
  0x2d   :  { %152 = vmatpush.msra.mxu1 %v123_v15 }
  0x2e   :  { %191 = vmatpush.msra.mxu2 %v166_v29 }
  0x2f   :  { %153 = vmatpush.msra.mxu1 %v122_v16 }
  0x30   :  { %192 = vmatpush.msra.mxu2 %v165_v30 }
  0x31   :  { %154 = vmatpush.msra.mxu1 %v121_v17 }
  0x32   :  { %193 = vmatpush.msra.mxu2 %v164_v31 }
  0x33   :  { %155 = vmatpush.msra.mxu1 %v120_v18 }
  0x34   :  { %194 = vmatpush.msra.mxu2 %v163_v36 }
  0x36   :  { %195 = vmatpush.msra.mxu2 %v162_v37 }
  0x38   :  { %196 = vmatpush.msra.mxu2 %v161_v38 }
  0x94   :  { %v116_v33 = vpop.f32.mrf.mxu0 }
  0x95   :  { %v117_v34 = vadd.f32 %v239_v32, %v116_v33 }
  0x97   :  { %v119_v35 = vmax.f32 %v117_v34, 0.0 }
  0x99   :  { %156 = vmatmul.f32.vlgmr.msra.gmra.mxu1 %v119_v35 }
 0x116   :  { %v157_v40 = vpop.f32.mrf.mxu1 }
 0x117   :  { %v158_v41 = vadd.f32 %v240_v39, %v157_v40 }
 0x119   :  { %v160_v42 = vmax.f32 %v158_v41, 0.0 }
 0x11b   :  { %197 = vmatmul.f32.vlgmr.msra.gmra.mxu2 %v160_v42 }
 0x19e   :  { %v198_v44 = vpop.f32.mrf.mxu2 }
 0x19f   :  { %v199_v45 = vadd.f32 %v241_v43, %v198_v44 }
 0x1a1   :  { %v206_v47 = vmax.f32 %v199_v45, -20.0 }
 0x1a3   :  { %v207_v48 = vmin.f32 %v206_v47, 2.0 }
 0x1a5   :  { %v208_v50 = vmul.f32 1.442695, %v207_v48 }
 0x1a7   :  { %242 = vpow2.f32 %v208_v50 }
 0x1ad   :  { %v243_v51 = vpop.eup %242 }
 0x1ae   :  { %v210_v52 = vsel %vm205_vm3, %v243_v51, %v199_v45 }
 0x1af   :  { %211 = vst [vmem:[#allocation10] sm:$0xff] %v210_v52 }
 0x1b0   :  { %222 = dma.vmem_to_hbm [thread:$0]  %s218_s4, 128, %s220_s27, [#allocation4]  }
 0x1b1   :  { %370 = dma.done.wait [#allocation4], 128  }
 0x1b2   :  { %371 = vsyncadd [#allocation4], 4294967168 }
 0x1b3   :  { %227 = vsyncpa [#allocation3], 1 }
 0x1b4   :  { %228 = vsyncpa [#allocation6], 1 }
 0x1b5   :  { %229 = vsyncpa [#allocation9], 1 }
 0x1b6   :  { %230 = vsyncpa [#allocation4], 1 }

</bundles_post_ra>
